<compile_context>
chip_gen: v5e
topology: v5e:2x2
jax: 0.10.0
libtpu: 0.0.40
codegen_flags: <defaults>
</compile_context>

<pallas_src>
import functools
from typing import NamedTuple, Optional

import jax
import jax.numpy as jnp
from jax.experimental import pallas as pl
from jax.experimental.pallas import tpu as pltpu

_LANE = 128
_SUBLANE = 8


def _round_up(x: int, m: int) -> int:
    return ((x + m - 1) // m) * m


def _cdiv(a: int, b: int) -> int:
    return (a + b - 1) // b


@functools.lru_cache(maxsize=1)
def _vmem_budget_bytes() -> int:
    """Usable scoped-VMEM budget derived from the chip's physical VMEM."""
    cap = 64 << 20  # conservative fallback (v7x per-TensorCore VMEM)
    try:
        info = pltpu.get_tpu_info()
        cap = int(getattr(info, "vmem_capacity_bytes", cap))
    except Exception:
        pass
    # v7x (64 MiB): stay near ~41 MiB.  v5e/v6e (128 MiB): allow ~96 MiB.
    frac = 0.65 if cap <= (64 << 20) else 0.75
    return int(cap * frac)


# ----------------------------------------------------------------------------
# Kernels
# ----------------------------------------------------------------------------
def _encode_kernel_fullk(x_ref, w_ref, b_ref, o_ref):
    # x_ref: (TM, Kp) activations (native dtype; cast to weight dtype here)
    # w_ref: (Kp, TN) pre-transposed, pre-padded weight (bf16 by default)
    # b_ref: (1, TN)  f32 bias slice for this N tile
    # o_ref: (TM, TN) output tile
    acc = jnp.dot(x_ref[...].astype(w_ref.dtype), w_ref[...],
                  preferred_element_type=jnp.float32)
    o_ref[...] = jax.nn.sigmoid(acc + b_ref[...]).astype(o_ref.dtype)


def _encode_kernel_ksplit(x_ref, w_ref, b_ref, o_ref, acc_ref):
    # Same as above, but the contraction dim is split over grid axis 2 and
    # accumulated in an f32 VMEM scratch.
    k = pl.program_id(2)

    @pl.when(k == 0)
    def _():
        acc_ref[...] = jnp.zeros_like(acc_ref)

    acc_ref[...] += jnp.dot(x_ref[...].astype(w_ref.dtype), w_ref[...],
                            preferred_element_type=jnp.float32)

    @pl.when(k == pl.num_programs(2) - 1)
    def _():
        o_ref[...] = jax.nn.sigmoid(acc_ref[...] + b_ref[...]).astype(o_ref.dtype)


# ----------------------------------------------------------------------------
# Parameter preparation (one-time; keeps the per-call hot path free of weight
# casts / pads / transposes)
# ----------------------------------------------------------------------------
class EncoderParams(NamedTuple):
    w_t: jax.Array   # (Kp, Np), pre-transposed + zero-padded, weight_dtype
    b: jax.Array     # (1, Np) f32, zero-padded
    d_out: int
    d_in: int
    tn: int
    tk: int
    nk: int


def prepare_encoder_params(weight, bias, *,
                           weight_dtype=jnp.bfloat16,
                           x_itemsize: int = 4,
                           out_itemsize: int = 4,
                           max_tn: Optional[int] = None,
                           max_tk: Optional[int] = None) -> EncoderParams:
    """Prepare nn.Linear params (PyTorch (D_out, D_in) layout) once.

    NOTE: weight_dtype=bf16 (default) streams the weight at half the HBM
    bytes but changes numerics vs. PyTorch's f32 Linear; pass
    weight_dtype=jnp.float32 for full-precision weights.
    `max_tn` / `max_tk` force extra tiling (mainly for testing).
    """
    d_out, d_in = weight.shape
    np_min = _round_up(d_out, _LANE)
    kp_min = _round_up(d_in, _LANE)
    budget = _vmem_budget_bytes()
    w_itemsize = jnp.dtype(weight_dtype).itemsize
    tm_assume = 256  # planning assumption; actual TM is chosen per call

    # At least two N blocks when possible so both v7x TensorCores get work.
    nj = 2 if np_min >= 2 * _LANE else 1
    nk = 1
    if max_tn is not None:
        nj = max(nj, _cdiv(np_min, max_tn))
    if max_tk is not None:
        nk = max(nk, _cdiv(kp_min, max_tk))

    def _tiles(nj_, nk_):
        tn_ = _round_up(_cdiv(np_min, nj_), _LANE)
        tk_ = _round_up(_cdiv(kp_min, nk_), _LANE)
        return tn_, tk_

    def _usage(tn_, tk_, nk_):
        vmem = 2 * tm_assume * tk_ * x_itemsize       # x tiles (double-buffered)
        vmem += 2 * tk_ * tn_ * w_itemsize            # weight tiles
        vmem += 2 * tn_ * 4                           # bias block
        vmem += 2 * tm_assume * tn_ * out_itemsize    # output tiles
        if nk_ > 1:
            vmem += tm_assume * tn_ * 4               # f32 accumulator scratch
        return vmem

    while True:
        tn, tk = _tiles(nj, nk)
        if _usage(tn, tk, nk) <= budget or (tn == _LANE and tk == _LANE):
            break
        # Prefer splitting N (keeps K whole -> no accumulator); then split K.
        if tn > _LANE and tn >= tk:
            nj += 1
        elif tk > _LANE:
            nk += 1
        else:
            nj += 1

    np_pad = nj * tn
    kp_pad = nk * tk

    w_t = jnp.zeros((kp_pad, np_pad), dtype=weight_dtype)
    w_t = w_t.at[:d_in, :d_out].set(jnp.asarray(weight).T.astype(weight_dtype))
    b_row = jnp.zeros((1, np_pad), dtype=jnp.float32)
    b_row = b_row.at[0, :d_out].set(jnp.asarray(bias).astype(jnp.float32))
    return EncoderParams(w_t, b_row, int(d_out), int(d_in),
                         int(tn), int(tk), int(nk))


# ----------------------------------------------------------------------------
# Per-call encode: sigmoid(x @ W^T + b)
# ----------------------------------------------------------------------------
@functools.partial(
    jax.jit,
    static_argnames=("d_out", "d_in", "tn", "tk", "nk", "out_dtype", "max_tm"))
def _encode_call(x, w_t, b_row, *, d_out, d_in, tn, tk, nk, out_dtype, max_tm):
    B, d_in_x = x.shape
    assert d_in_x == d_in, (d_in_x, d_in)
    kp = nk * tk
    np_pad = b_row.shape[1]
    nj = np_pad // tn

    budget = _vmem_budget_bytes()
    x_itemsize = x.dtype.itemsize
    w_itemsize = w_t.dtype.itemsize
    out_itemsize = jnp.dtype(out_dtype).itemsize

    # Per-call M tile: as big as the VMEM budget allows (ideally ni == 1 so the
    # weight is streamed from HBM exactly once per call).
    fixed = 2 * tk * tn * w_itemsize + 2 * tn * 4
    per_row = (2 * tk * x_itemsize + 2 * tn * out_itemsize
               + (tn * 4 if nk > 1 else 0))
    tm_max = max(_SUBLANE, ((budget - fixed) // per_row) // _SUBLANE * _SUBLANE)
    if max_tm is not None:
        tm_max = min(tm_max, max_tm)
    tm = min(_round_up(B, _SUBLANE), tm_max)
    ni = _cdiv(_round_up(B, _SUBLANE), tm)
    mp = ni * tm

    # Pad x only when needed (padded K columns contribute 0 to the dot).
    if mp == B and kp == d_in:
        x_p = x
    else:
        x_p = jnp.pad(x, ((0, mp - B), (0, kp - d_in)))

    cost = pl.CostEstimate(
        flops=2 * mp * np_pad * kp,
        transcendentals=mp * np_pad,
        bytes_accessed=(mp * kp * x_itemsize + kp * np_pad * w_itemsize
                        + np_pad * 4 + mp * np_pad * out_itemsize))
    vmem_limit = min(budget, 128 << 20)

    if nk == 1:
        out_p = pl.pallas_call(
            _encode_kernel_fullk,
            out_shape=jax.ShapeDtypeStruct((mp, np_pad), out_dtype),
            grid_spec=pltpu.PrefetchScalarGridSpec(
                num_scalar_prefetch=0,
                grid=(ni, nj),
                in_specs=[
                    pl.BlockSpec((tm, kp), lambda i, j: (i, 0)),   # x
                    pl.BlockSpec((kp, tn), lambda i, j: (0, j)),   # W^T
                    pl.BlockSpec((1, tn), lambda i, j: (0, j)),    # bias
                ],
                out_specs=pl.BlockSpec((tm, tn), lambda i, j: (i, j)),
            ),
            compiler_params=pltpu.CompilerParams(
                dimension_semantics=("parallel", "parallel"),
                vmem_limit_bytes=vmem_limit,
            ),
            cost_estimate=cost,
        )(x_p, w_t, b_row)
    else:
        out_p = pl.pallas_call(
            _encode_kernel_ksplit,
            out_shape=jax.ShapeDtypeStruct((mp, np_pad), out_dtype),
            grid_spec=pltpu.PrefetchScalarGridSpec(
                num_scalar_prefetch=0,
                grid=(ni, nj, nk),
                in_specs=[
                    pl.BlockSpec((tm, tk), lambda i, j, k: (i, k)),   # x
                    pl.BlockSpec((tk, tn), lambda i, j, k: (k, j)),   # W^T
                    pl.BlockSpec((1, tn), lambda i, j, k: (0, j)),    # bias
                ],
                out_specs=pl.BlockSpec((tm, tn), lambda i, j, k: (i, j)),
                scratch_shapes=[pltpu.VMEM((tm, tn), jnp.float32)],
            ),
            compiler_params=pltpu.CompilerParams(
                dimension_semantics=("parallel", "parallel", "arbitrary"),
                vmem_limit_bytes=vmem_limit,
            ),
            cost_estimate=cost,
        )(x_p, w_t, b_row)

    return out_p[:B, :d_out]


def encode_pallas(x, params: EncoderParams, *, out_dtype=jnp.float32,
                  max_tm: Optional[int] = None):
    """Pallas equivalent of nn.Sequential(nn.Linear, nn.Sigmoid())."""
    return _encode_call(x, params.w_t, params.b,
                        d_out=params.d_out, d_in=params.d_in,
                        tn=params.tn, tk=params.tk, nk=params.nk,
                        out_dtype=out_dtype, max_tm=max_tm)


def autoencoders_forward(x, params_list):
    """Mirror of `autoencoders.forward`: apply every registered encoder to x
    and return a Python list of outputs (EBLL registers a single encoder '0')."""
    return [encode_pallas(x, p) for p in params_list]


if __name__ == "__main__":
    key = jax.random.PRNGKey(0)
    kx, kw, kb, kx2, kw2, kb2, kx3, kw3, kb3 = jax.random.split(key, 9)

    # --- 1) Small, tile-aligned shapes consistent with the module ----------
    B, D_IN, D_CODE = 8, 256, 128
    x = jax.random.normal(kx, (B, D_IN), dtype=jnp.float32)
    weight = jax.random.normal(kw, (D_CODE, D_IN), dtype=jnp.float32) * 0.02
    bias = jax.random.normal(kb, (D_CODE,), dtype=jnp.float32) * 0.01

    params = prepare_encoder_params(weight, bias)          # bf16 weights (default)
    outs = autoencoders_forward(x, [params])               # list, as in PyTorch
    outs = [jax.block_until_ready(o) for o in outs]
    assert isinstance(outs, list) and len(outs) == 1
    assert outs[0].shape == (B, D_CODE)

    ref_bf = jax.nn.sigmoid(
        x.astype(jnp.bfloat16).astype(jnp.float32)
        @ weight.astype(jnp.bfloat16).astype(jnp.float32).T + bias)
    assert jnp.allclose(outs[0], ref_bf, atol=2e-3, rtol=2e-3)
    ref_f32 = jax.nn.sigmoid(x @ weight.T + bias)
    assert jnp.allclose(outs[0], ref_f32, atol=3e-2, rtol=3e-2)

    # Optional bf16 output (halves writeback); compute stays f32.
    out_bf16 = jax.block_until_ready(
        encode_pallas(x, params, out_dtype=jnp.bfloat16))
    assert out_bf16.dtype == jnp.bfloat16
    assert jnp.allclose(out_bf16.astype(jnp.float32), ref_bf, atol=1e-2, rtol=1e-2)

    # Optional full-precision weight path (documented choice).
    params_f32 = prepare_encoder_params(weight, bias, weight_dtype=jnp.float32)
    out_f32w = jax.block_until_ready(encode_pallas(x, params_f32))
    ref_hi = jax.nn.sigmoid(
        jnp.dot(x, weight.T, precision=jax.lax.Precision.HIGHEST) + bias)
    assert jnp.allclose(out_f32w, ref_hi, atol=1e-3, rtol=1e-3)

    # --- 2) Non-aligned dims exercise the padding / slicing path -----------
    B2, D_IN2, D_CODE2 = 5, 200, 100
    x2 = jax.random.normal(kx2, (B2, D_IN2), dtype=jnp.float32)
    w2 = jax.random.normal(kw2, (D_CODE2, D_IN2), dtype=jnp.float32) * 0.02
    b2 = jax.random.normal(kb2, (D_CODE2,), dtype=jnp.float32) * 0.01
    p2 = prepare_encoder_params(w2, b2)
    out2 = jax.block_until_ready(encode_pallas(x2, p2))
    assert out2.shape == (B2, D_CODE2)
    ref2 = jax.nn.sigmoid(
        x2.astype(jnp.bfloat16).astype(jnp.float32)
        @ w2.astype(jnp.bfloat16).astype(jnp.float32).T + b2)
    assert jnp.allclose(out2, ref2, atol=2e-3, rtol=2e-3)

    # --- 3) Forced multi-tile grid + K-split accumulator path --------------
    B3, D_IN3, D_CODE3 = 64, 512, 384
    x3 = jax.random.normal(kx3, (B3, D_IN3), dtype=jnp.float32)
    w3 = jax.random.normal(kw3, (D_CODE3, D_IN3), dtype=jnp.float32) * 0.02
    b3 = jax.random.normal(kb3, (D_CODE3,), dtype=jnp.float32) * 0.01
    p3 = prepare_encoder_params(w3, b3, max_tn=128, max_tk=256)
    assert p3.nk == 2 and p3.tn == 128 and p3.tk == 256
    out3 = jax.block_until_ready(encode_pallas(x3, p3, max_tm=32))
    assert out3.shape == (B3, D_CODE3)
    ref3 = jax.nn.sigmoid(
        x3.astype(jnp.bfloat16).astype(jnp.float32)
        @ w3.astype(jnp.bfloat16).astype(jnp.float32).T + b3)
    assert jnp.allclose(out3, ref3, atol=2e-3, rtol=2e-3)

    print("KERNEL_OK")
</pallas_src>

<mosaic_0001>
module attributes {stable_mosaic.version = 11 : i64} {
  func.func @_encode_kernel_fullk(%arg0: i32, %arg1: i32, %arg2: memref<8x256xf32, #tpu.memory_space<vmem>>, %arg3: memref<256x128xbf16, #tpu.memory_space<vmem>>, %arg4: memref<1x128xf32, #tpu.memory_space<vmem>>, %arg5: memref<8x128xf32, #tpu.memory_space<vmem>>) attributes {dimension_semantics = [#tpu.dimension_semantics<parallel>, #tpu.dimension_semantics<parallel>], iteration_bounds = array<i64: 1, 1>, scalar_prefetch = 0 : i64, scratch_operands = 0 : i64, tpu.core_type = #tpu.core_type<tc>, window_params = [{transform_indices = @transform_0, window_bounds = array<i64: 8, 256>}, {transform_indices = @transform_1, window_bounds = array<i64: 256, 128>}, {transform_indices = @transform_2, window_bounds = array<i64: 1, 128>}, {transform_indices = @transform_3, window_bounds = array<i64: 8, 128>}]} {
    %c0 = arith.constant 0 : index
    %c0_0 = arith.constant 0 : index
    %0 = vector.load %arg2[%c0, %c0_0] : memref<8x256xf32, #tpu.memory_space<vmem>>, vector<8x256xf32>
    %1 = arith.truncf %0 : vector<8x256xf32> to vector<8x256xbf16>
    %c0_1 = arith.constant 0 : index
    %c0_2 = arith.constant 0 : index
    %2 = vector.load %arg3[%c0_1, %c0_2] : memref<256x128xbf16, #tpu.memory_space<vmem>>, vector<256x128xbf16>
    %cst = arith.constant dense<0.000000e+00> : vector<8x128xf32>
    %3 = tpu.matmul %1, %2, %cst {dimension_numbers = #tpu.dot_dimension_numbers<[1], [0], [0], [1], [0, 0, 1, 1], [], []>} : vector<8x256xbf16>, vector<256x128xbf16>, vector<8x128xf32> -> vector<8x128xf32>
    %c0_3 = arith.constant 0 : index
    %c0_4 = arith.constant 0 : index
    %4 = vector.load %arg4[%c0_3, %c0_4] : memref<1x128xf32, #tpu.memory_space<vmem>>, vector<1x128xf32>
    %5 = vector.broadcast %4 : vector<1x128xf32> to vector<8x128xf32>
    %6 = arith.addf %3, %5 : vector<8x128xf32>
    %7 = arith.negf %6 : vector<8x128xf32>
    %8 = math.exp %7 : vector<8x128xf32>
    %cst_5 = arith.constant 1.000000e+00 : f32
    %9 = vector.broadcast %cst_5 : f32 to vector<8x128xf32>
    %10 = arith.addf %9, %8 : vector<8x128xf32>
    %11 = arith.divf %9, %10 : vector<8x128xf32>
    %c0_6 = arith.constant 0 : index
    %c0_7 = arith.constant 0 : index
    %12 = vector.load %arg5[%c0_6, %c0_7] : memref<8x128xf32, #tpu.memory_space<vmem>>, vector<8x128xf32>
    tpu.vector_store %arg5[%c0_6, %c0_7], %11 {strides = array<i32>} : memref<8x128xf32, #tpu.memory_space<vmem>>, vector<8x128xf32>,
    return
  }
  func.func @transform_0(%arg0: i32, %arg1: i32) -> (i32, i32) {
    %c0_i32 = arith.constant 0 : i32
    %c0_i32_0 = arith.constant 0 : i32
    return %arg0, %c0_i32 : i32, i32
  }
  func.func @transform_1(%arg0: i32, %arg1: i32) -> (i32, i32) {
    %c0_i32 = arith.constant 0 : i32
    %c0_i32_0 = arith.constant 0 : i32
    return %c0_i32, %arg1 : i32, i32
  }
  func.func @transform_2(%arg0: i32, %arg1: i32) -> (i32, i32) {
    %c0_i32 = arith.constant 0 : i32
    %c0_i32_0 = arith.constant 0 : i32
    return %c0_i32, %arg1 : i32, i32
  }
  func.func @transform_3(%arg0: i32, %arg1: i32) -> (i32, i32) {
    %c0_i32 = arith.constant 0 : i32
    return %arg0, %arg1 : i32, i32
  }
}

</mosaic_0001>

<bundles_post_ra>
// kernel: _encode_call.1
= control target key start
LH: loop header
LB: loop body
LE: loop exit
PB: predicated region body
PF: predicated region fallthrough
CT: control target
= control target key end

     0   :  { %8 = vsyncpa [#allocation3], 0  ;;  %s451_s0 = inlined_call_operand.hbm [shape: f32[8,256], index: 0, kind: input, shape index: {}]   ;;  %s452_s1 = inlined_call_operand.hbm [shape: bf16[256,128], index: 1, kind: input, shape index: {}]   ;;  %s453_s2 = inlined_call_operand.vmem [shape: f32[1,128], index: 2, kind: input, shape index: {}]   ;;  %s454_s3 = inlined_call_operand.hbm [shape: f32[8,128], index: 3, kind: output, shape index: {}]  }
   0x1   :  { %9 = vsyncpa [#allocation6], 0 }
   0x2   :  { %10 = vsyncpa [#allocation4], 0  ;;  %s16_s14 = sshll.u32 %s451_s0, 4  ;;  %s414_s15 = smov [#allocation2]   ;;  %s17_s14 = int_to_ptr.hbm [resolvable:$true] %s16_s14 }
   0x3   :  { %s18_s16 = sshll.u32 %s414_s15, 4  ;;  %s26_s19 = sshll.u32 %s452_s1, 4  ;;  %s19_s16 = int_to_ptr.vmem [resolvable:$true] %s18_s16  ;;  %s27_s19 = int_to_ptr.hbm [resolvable:$true] %s26_s19 }
   0x4   :  { %21 = dma.hbm_to_vmem [thread:$0]  %s17_s14, 256, %s19_s16, [#allocation3]  }
   0x5   :  { %s415_s20 = smov [#allocation5]   ;;  %s416_s22 = smov 64  }
   0x6   :  { %s28_s21 = sshll.u32 %s415_s20, 4  ;;  %s417_s23 = smov 4   ;;  %s29_s21 = int_to_ptr.vmem [resolvable:$true] %s28_s21 }
   0x7   :  { %34 = dma.hbm_to_vmem [thread:$0]  %s27_s19, 2048, %s29_s21, [#allocation6], %s416_s22, %s416_s22, %s417_s23  }
   0x8   :  { %408 = dma.done.wait [#allocation3], 256  }
   0x9   :  { %409 = vsyncadd [#allocation3], 4294967040 }
   0xa   :  { %410 = dma.done.wait [#allocation6], 2048  }
   0xb   :  { %411 = vsyncadd [#allocation6], 4294965248  ;;  %v317_v0 = vld [vmem:[#allocation5 + $0x38] sm:$0xff]  ;;  %v316_v2 = vld [vmem:[#allocation5 + $0x30] sm:$0xff]  ;;  %s418_s24 = smov [#allocation7]   ;;  %s234_s27 = sshll.u32 %s454_s3, 4  ;;  %s235_s27 = int_to_ptr.hbm [resolvable:$true] %s234_s27 }
   0xc   :  { %v325_v1 = vld [vmem:[#allocation5 + $0x78] sm:$0xff]  ;;  %181 = vmatpush.bf16.msra.mxu0 %v317_v0  ;;  %v324_v3 = vld [vmem:[#allocation5 + $0x70] sm:$0xff]  ;;  %v315_v4 = vld [vmem:[#allocation5 + $0x28] sm:$0xff] }
   0xd   :  { %194 = vmatpush.bf16.msra.mxu1 %v325_v1  ;;  %v323_v5 = vld [vmem:[#allocation5 + $0x68] sm:$0xff]  ;;  %v314_v6 = vld [vmem:[#allocation5 + $0x20] sm:$0xff]  ;;  %v313_v8 = vld [vmem:[#allocation5 + $0x18] sm:$0xff] }
   0xe   :  { %v322_v7 = vld [vmem:[#allocation5 + $0x60] sm:$0xff]  ;;  %v321_v9 = vld [vmem:[#allocation5 + $0x58] sm:$0xff]  ;;  %v312_v10 = vld [vmem:[#allocation5 + $0x10] sm:$0xff] }
   0xf   :  { %v320_v11 = vld [vmem:[#allocation5 + $0x50] sm:$0xff]  ;;  %v311_v12 = vld [vmem:[#allocation5 + $0x8] sm:$0xff]  ;;  %v310_v14 = vld [vmem:[#allocation5] sm:$0xff] }
  0x10   :  { %182 = vmatpush.bf16.msra.mxu0 %v316_v2  ;;  %v319_v13 = vld [vmem:[#allocation5 + $0x48] sm:$0xff]  ;;  %v318_v15 = vld [vmem:[#allocation5 + $0x40] sm:$0xff]  ;;  %v45_v16 = vld [vmem:[#allocation2] sm:$0xff] }
  0x11   :  { %195 = vmatpush.bf16.msra.mxu1 %v324_v3  ;;  %v46_v17 = vld [vmem:[#allocation2 + $0x8] sm:$0xff]  ;;  %v47_v18 = vpack.c.bf16 %v45_v16, %v45_v16  ;;  %v331_v20 = vld [vmem:[%s453_s2] ss:$0 sm:$0xff]  ;;  %s232_s2 = sshll.u32 %s418_s24, 4  ;;  %s233_s2 = int_to_ptr.vmem [resolvable:$true] %s232_s2 }
  0x12   :  { %v48_v19 = vpack.c.bf16 %v46_v17, %v46_v17 }
  0x14   :  { %183 = vmatpush.bf16.msra.mxu0 %v315_v4 }
  0x15   :  { %196 = vmatpush.bf16.msra.mxu1 %v323_v5 }
  0x18   :  { %184 = vmatpush.bf16.msra.mxu0 %v314_v6 }
  0x19   :  { %197 = vmatpush.bf16.msra.mxu1 %v322_v7 }
  0x1c   :  { %185 = vmatpush.bf16.msra.mxu0 %v313_v8 }
  0x1d   :  { %198 = vmatpush.bf16.msra.mxu1 %v321_v9 }
  0x20   :  { %186 = vmatpush.bf16.msra.mxu0 %v312_v10 }
  0x21   :  { %199 = vmatpush.bf16.msra.mxu1 %v320_v11 }
  0x24   :  { %187 = vmatpush.bf16.msra.mxu0 %v311_v12 }
  0x25   :  { %200 = vmatpush.bf16.msra.mxu1 %v319_v13 }
  0x28   :  { %188 = vmatpush.bf16.msra.mxu0 %v310_v14 }
  0x29   :  { %201 = vmatpush.bf16.msra.mxu1 %v318_v15 }
  0x2b   :  { %189 = vmatmul.bf16.vlgmr.msra.gmra.mxu0 %v47_v18 }
  0x2c   :  { %202 = vmatmul.bf16.vlgmr.msra.gmra.mxu1 %v48_v19 }
  0xa8   :  { %v190_v21 = vpop.f32.mrf.mxu0 }
  0xa9   :  { %v203_v22 = vpop.f32.mrf.mxu1  ;;  %v191_v23 = vadd.f32 %v331_v20, %v190_v21 }
  0xab   :  { %v204_v24 = vadd.f32 %v203_v22, %v191_v23 }
  0xad   :  { %v309_v25 = vmul.f32 -1.442695, %v204_v24 }
  0xaf   :  { %332 = vpow2.f32 %v309_v25 }
  0xb0   :  { %v192_v26 = vpop.f32.mrf.mxu0 }
  0xb1   :  { %v205_v27 = vpop.f32.mrf.mxu1 }
  0xb5   :  { %v333_v28 = vpop.eup %332 }
  0xb6   :  { %v210_v29 = vadd.f32 1.0, %v333_v28 }
  0xb8   :  { %334 = vrcp.f32 %v210_v29  ;;  %v222_v33 = vand.u32 2147483648, %v210_v29  ;;  %v220_v35 = vand.u32 2147483647, %v210_v29  ;;  %vm216_vm1 = vweird.f32 %v210_v29 }
  0xba   :  { %v223_v37 = vor.u32 1.1754944e-38, %v222_v33  ;;  %vm221_vm3 = vcmp.eq.f32.partialorder %v220_v35, 8.507059e+37 }
  0xbe   :  { %v335_v30 = vpop.eup %334 }
  0xbf   :  { %v212_v31 = vmul.f32 %v335_v30, %v210_v29  ;;  %vm217_vm0 = vweird.f32 %v335_v30 }
  0xc0   :  { %vm218_vm2 = vmor %vm216_vm1, %vm217_vm0 }
  0xc1   :  { %v213_v32 = vsub.f32 1.0, %v212_v31 }
  0xc3   :  { %v214_v34 = vmul.f32 %v335_v30, %v213_v32 }
  0xc5   :  { %v215_v36 = vadd.f32 %v335_v30, %v214_v34 }
  0xc7   :  { %v219_v38 = vsel %vm218_vm2, %v335_v30, %v215_v36 }
  0xc8   :  { %v224_v39 = vsel %vm221_vm3, %v223_v37, %v219_v38 }
  0xc9   :  { %226 = vst [vmem:[#allocation7] sm:$0xff] %v224_v39 }
  0xca   :  { %237 = dma.vmem_to_hbm [thread:$0]  %s233_s2, 128, %s235_s27, [#allocation4]  }
  0xcb   :  { %412 = dma.done.wait [#allocation4], 128  }
  0xcc   :  { %413 = vsyncadd [#allocation4], 4294967168 }
  0xcd   :  { %242 = vsyncpa [#allocation3], 1 }
  0xce   :  { %243 = vsyncpa [#allocation6], 1 }
  0xcf   :  { %244 = vsyncpa [#allocation4], 1 }

</bundles_post_ra>
